<compile_context>
chip_gen: v7x
topology: tpu7x:2x2x1
jax: 0.10.0
libtpu: 0.0.40
codegen_flags: <defaults>
</compile_context>

<pallas_src>
import math

import jax
import jax.numpy as jnp
from jax.experimental import pallas as pl
from jax.experimental.pallas import tpu as pltpu

KH = KW = 3  # depthwise kernel size


def _sep_conv_kernel(xp_ref, dw_ref, pw_ref, b_ref, o_ref):
    """One grid step == one (batch element, TH-row output tile).

    xp_ref : (Hp, Wp, Cin)    padded input image (resident per batch index)
    dw_ref : (KH*KW, 1, Cin)  depthwise taps, fp32
    pw_ref : (Cin, Cout)      pointwise weight (compute dtype)
    b_ref  : (1, Cout)        pointwise bias, fp32
    o_ref  : (TH, W, Cout)    output row tile
    """
    TH, W, Cout = o_ref.shape
    Cin = xp_ref.shape[-1]
    row0 = pl.multiple_of(pl.program_id(1) * TH, TH)

    # --- depthwise 3x3 on the VPU ---------------------------------------
    # 3 kw-shifted slabs loaded once each (3 sublane-offset loads, not 9);
    # kh offsets are static slices of the untiled leading dim.  Traced fp32
    # accumulation -- no VMEM scratch round-trips.
    dw_acc = None
    for kw in range(KW):
        slab = xp_ref[pl.ds(row0, TH + KH - 1), pl.ds(kw, W), :].astype(jnp.float32)
        for kh in range(KH):
            tap = slab[kh:kh + TH] * dw_ref[kh * KW + kw]        # (TH, W, Cin)
            dw_acc = tap if dw_acc is None else dw_acc + tap

    # --- single pointwise matmul on the MXU ------------------------------
    # One reshape into lane-major (TH*W, Cin), one fp32-accumulating dot,
    # bias folded into the same epilogue pass, one reshape back out.
    m = dw_acc.astype(pw_ref.dtype).reshape(TH * W, Cin)
    y = jnp.dot(m, pw_ref[...], preferred_element_type=jnp.float32)  # (TH*W, Cout)
    o_ref[...] = (y + b_ref[...]).astype(o_ref.dtype).reshape(TH, W, Cout)


def _vmem_capacity_bytes():
    """Per-TensorCore VMEM capacity; conservative fallback if unqueryable."""
    try:
        info = pltpu.get_tpu_info()
        cap = getattr(info, "vmem_capacity_bytes", None)
        if cap:
            return int(cap)
    except Exception:
        pass
    return 64 * 1024 * 1024  # v7x per-TC VMEM (smallest of v5e/v6e/v7x)


def _choose_row_tile(H, N, per_row_bytes, row_budget):
    """Largest divisor of H whose per-step working set fits `row_budget`,
    preferring >= 8 total grid steps (>= 4 per TensorCore under v7x megacore
    sharding) so the pipeline actually double-buffers."""
    divisors = sorted((d for d in range(1, H + 1) if H % d == 0), reverse=True)
    fitting = [d for d in divisors if d * per_row_bytes <= row_budget] or [1]
    for th in fitting:
        if N * (H // th) >= 8:
            return th
    for th in fitting:
        if H // th >= 2:
            return th
    return fitting[0]


def separable_conv_block(x_nchw, dw_weight, pw_weight, pw_bias, *, compute_dtype=None):
    """SeparableConvBlock forward (stride=1, norm=False, activation=False).

    x_nchw   : (N, Cin, H, W)
    dw_weight: (Cin, 1, 3, 3)   (PyTorch depthwise layout)
    pw_weight: (Cout, Cin, 1, 1)
    pw_bias  : (Cout,)
    compute_dtype: optional (e.g. jnp.bfloat16) for the matmul/image operands;
                   depthwise + MXU accumulation stay fp32.
    returns  : (N, Cout, H, W)
    """
    N, Cin, H, W = x_nchw.shape
    Cout = pw_weight.shape[0]
    out_dtype = x_nchw.dtype
    cdt = jnp.dtype(compute_dtype) if compute_dtype is not None else jnp.dtype(out_dtype)

    # --- TF/keras "same" padding (stride=1, k=3 -> 1 px each side) ----------
    stride = 1
    h_step = math.ceil(W / stride)
    v_step = math.ceil(H / stride)
    extra_h = stride * (h_step - 1) + 1 + (KW - 1) - W
    extra_v = stride * (v_step - 1) + 1 + (KH - 1) - H
    left = extra_h // 2
    right = extra_h - left
    top = extra_v // 2
    bottom = extra_v - top
    # TODO(synk): window/grid index math assumes stride=1; a stride=2 variant
    # of SeparableConvBlock needs different arithmetic.

    # NCHW -> NHWC (channels on lanes for the pointwise matmul) + halo pad.
    # TODO(synk): in a full network keep activations NHWC end-to-end and fold
    # the 1-px halo into the kernel (masked edge rows) to drop this HBM pass.
    x_nhwc = jnp.transpose(x_nchw, (0, 2, 3, 1)).astype(cdt)
    xp = jnp.pad(x_nhwc, ((0, 0), (top, bottom), (left, right), (0, 0)))
    Hp, Wp = H + top + bottom, W + left + right

    # Weights: depthwise taps fp32 (VPU path), pointwise in compute dtype
    # (MXU operand), bias fp32 (epilogue).
    dw_k = jnp.transpose(dw_weight[:, 0, :, :].reshape(Cin, KH * KW), (1, 0))
    dw_k = dw_k.reshape(KH * KW, 1, Cin).astype(jnp.float32)
    pw = jnp.transpose(pw_weight[:, :, 0, 0], (1, 0)).astype(cdt)      # (Cin, Cout)
    bias = pw_bias.astype(jnp.float32).reshape(1, Cout)

    # --- generation-aware VMEM planning --------------------------------------
    in_esize = jnp.dtype(cdt).itemsize
    out_esize = jnp.dtype(out_dtype).itemsize
    vmem_budget = int(_vmem_capacity_bytes() * 0.8)
    img_bytes = Hp * Wp * Cin * in_esize
    # Rough per-output-row working set: double-buffered output block + fp32
    # slab copies / depthwise accumulator / matmul result temporaries.
    per_row_bytes = W * (2 * Cout * out_esize + 5 * Cin * 4 + 3 * Cout * 4)
    # Resident padded image: default double-buffered; single buffer when two
    # copies would crowd VMEM (matters on v7x's 64 MiB/TC).
    img_buffers = 2 if 2 * img_bytes + 8 * per_row_bytes <= vmem_budget else 1
    row_budget = max(vmem_budget - img_buffers * img_bytes, per_row_bytes)
    TH = _choose_row_tile(H, N, per_row_bytes, row_budget)
    grid = (N, H // TH)

    img_spec_kwargs = {} if img_buffers == 2 else {"pipeline_mode": pl.Buffered(1)}
    # TODO(synk): if the padded image exceeds the VMEM budget even
    # single-buffered, halo-tile it along H with a manual DMA instead.
    img_spec = pl.BlockSpec((None, Hp, Wp, Cin), lambda n, h: (n, 0, 0, 0),
                            **img_spec_kwargs)

    out_nhwc = pl.pallas_call(
        _sep_conv_kernel,
        out_shape=jax.ShapeDtypeStruct((N, H, W, Cout), out_dtype),
        grid_spec=pltpu.PrefetchScalarGridSpec(
            num_scalar_prefetch=0,
            grid=grid,
            in_specs=[
                img_spec,                                              # padded image
                pl.BlockSpec((KH * KW, 1, Cin), lambda n, h: (0, 0, 0)),
                pl.BlockSpec((Cin, Cout), lambda n, h: (0, 0)),
                pl.BlockSpec((1, Cout), lambda n, h: (0, 0)),
            ],
            out_specs=pl.BlockSpec((None, TH, W, Cout), lambda n, h: (n, h, 0, 0)),
        ),
        compiler_params=pltpu.CompilerParams(
            dimension_semantics=("parallel", "parallel"),
            vmem_limit_bytes=vmem_budget,
        ),
    )(xp, dw_k, pw, bias)

    return jnp.transpose(out_nhwc, (0, 3, 1, 2))   # NHWC -> NCHW


def _reference(x_nchw, dw_weight, pw_weight, pw_bias):
    """Pure-JAX reference using lax conv (sanity check)."""
    y = jax.lax.conv_general_dilated(
        x_nchw, dw_weight,
        window_strides=(1, 1), padding=((1, 1), (1, 1)),
        feature_group_count=x_nchw.shape[1],
        dimension_numbers=("NCHW", "OIHW", "NCHW"))
    y = jax.lax.conv_general_dilated(
        y, pw_weight,
        window_strides=(1, 1), padding=((0, 0), (0, 0)),
        dimension_numbers=("NCHW", "OIHW", "NCHW"))
    return y + pw_bias.reshape(1, -1, 1, 1)


if __name__ == "__main__":
    key = jax.random.PRNGKey(0)
    k_x, k_dw, k_pw, k_b = jax.random.split(key, 4)

    N, Cin, Cout, H, W = 2, 4, 8, 16, 16

    x = jax.random.normal(k_x, (N, Cin, H, W), dtype=jnp.float32)
    dw_weight = jax.random.normal(k_dw, (Cin, 1, KH, KW), dtype=jnp.float32) * 0.1
    pw_weight = jax.random.normal(k_pw, (Cout, Cin, 1, 1), dtype=jnp.float32) * 0.1
    pw_bias = jax.random.normal(k_b, (Cout,), dtype=jnp.float32) * 0.1

    ref = _reference(x, dw_weight, pw_weight, pw_bias)

    # fp32 path (tolerance covers default MXU precision on f32 operands)
    out = jax.block_until_ready(separable_conv_block(x, dw_weight, pw_weight, pw_bias))
    assert out.shape == (N, Cout, H, W)
    assert jnp.allclose(out, ref, atol=2e-3, rtol=2e-3), \
        f"max abs err = {float(jnp.max(jnp.abs(out - ref)))}"

    # bf16 compute path (half the image/weight DMA; fp32 accumulate in-kernel)
    out_bf16 = jax.block_until_ready(
        separable_conv_block(x, dw_weight, pw_weight, pw_bias,
                             compute_dtype=jnp.bfloat16))
    assert jnp.allclose(out_bf16, ref, atol=5e-2, rtol=5e-2)

    # TODO(synk): norm/activation branches (BatchNorm2d, Swish) are off in
    # SeparableConvBlock(norm=False, activation=False) and are not exercised.
    print("KERNEL_OK")
</pallas_src>

<mosaic_0001>
module attributes {stable_mosaic.version = 11 : i64} {
  func.func @_sep_conv_kernel(%arg0: i32, %arg1: i32, %arg2: memref<1x18x18x4xf32, #tpu.memory_space<vmem>>, %arg3: memref<9x1x4xf32, #tpu.memory_space<vmem>>, %arg4: memref<4x8xf32, #tpu.memory_space<vmem>>, %arg5: memref<1x8xf32, #tpu.memory_space<vmem>>, %arg6: memref<1x4x16x8xf32, #tpu.memory_space<vmem>>) attributes {dimension_semantics = [#tpu.dimension_semantics<parallel>, #tpu.dimension_semantics<parallel>], iteration_bounds = array<i64: 2, 4>, scalar_prefetch = 0 : i64, scratch_operands = 0 : i64, tpu.core_type = #tpu.core_type<tc>, window_params = [{transform_indices = @transform_0, window_bounds = array<i64: 1, 18, 18, 4>}, {pipeline_mode = #tpu.pipeline_mode<synchronous>, transform_indices = @transform_1, window_bounds = array<i64: 9, 1, 4>}, {pipeline_mode = #tpu.pipeline_mode<synchronous>, transform_indices = @transform_2, window_bounds = array<i64: 4, 8>}, {pipeline_mode = #tpu.pipeline_mode<synchronous>, transform_indices = @transform_3, window_bounds = array<i64: 1, 8>}, {transform_indices = @transform_4, window_bounds = array<i64: 1, 4, 16, 8>}]} {
    %c4_i32 = arith.constant 4 : i32
    %0 = arith.muli %arg1, %c4_i32 : i32
    %1 = tpu.assume_multiple %0, 4 : i32
    %c0 = arith.constant 0 : index
    %2 = arith.index_cast %1 : i32 to index
    %c0_0 = arith.constant 0 : index
    %c0_1 = arith.constant 0 : index
    %3 = vector.load %arg2[%c0, %2, %c0_0, %c0_1] : memref<1x18x18x4xf32, #tpu.memory_space<vmem>>, vector<1x6x16x4xf32>
    %4 = vector.shape_cast %3 : vector<1x6x16x4xf32> to vector<6x16x4xf32>
    %5 = vector.extract_strided_slice %4 {offsets = [0, 0, 0], sizes = [4, 16, 4], strides = [1, 1, 1]} : vector<6x16x4xf32> to vector<4x16x4xf32>
    %c0_2 = arith.constant 0 : index
    %c0_3 = arith.constant 0 : index
    %c0_4 = arith.constant 0 : index
    %6 = vector.load %arg3[%c0_2, %c0_3, %c0_4] : memref<9x1x4xf32, #tpu.memory_space<vmem>>, vector<1x1x4xf32>
    %7 = vector.shape_cast %6 : vector<1x1x4xf32> to vector<1x4xf32>
    %8 = vector.shape_cast %7 : vector<1x4xf32> to vector<1x1x4xf32>
    %9 = vector.broadcast %8 : vector<1x1x4xf32> to vector<4x16x4xf32>
    %10 = arith.mulf %5, %9 : vector<4x16x4xf32>
    %11 = vector.extract_strided_slice %4 {offsets = [1, 0, 0], sizes = [4, 16, 4], strides = [1, 1, 1]} : vector<6x16x4xf32> to vector<4x16x4xf32>
    %c3 = arith.constant 3 : index
    %c0_5 = arith.constant 0 : index
    %c0_6 = arith.constant 0 : index
    %12 = vector.load %arg3[%c3, %c0_5, %c0_6] : memref<9x1x4xf32, #tpu.memory_space<vmem>>, vector<1x1x4xf32>
    %13 = vector.shape_cast %12 : vector<1x1x4xf32> to vector<1x4xf32>
    %14 = vector.shape_cast %13 : vector<1x4xf32> to vector<1x1x4xf32>
    %15 = vector.broadcast %14 : vector<1x1x4xf32> to vector<4x16x4xf32>
    %16 = arith.mulf %11, %15 : vector<4x16x4xf32>
    %17 = arith.addf %10, %16 : vector<4x16x4xf32>
    %18 = vector.extract_strided_slice %4 {offsets = [2, 0, 0], sizes = [4, 16, 4], strides = [1, 1, 1]} : vector<6x16x4xf32> to vector<4x16x4xf32>
    %c6 = arith.constant 6 : index
    %c0_7 = arith.constant 0 : index
    %c0_8 = arith.constant 0 : index
    %19 = vector.load %arg3[%c6, %c0_7, %c0_8] : memref<9x1x4xf32, #tpu.memory_space<vmem>>, vector<1x1x4xf32>
    %20 = vector.shape_cast %19 : vector<1x1x4xf32> to vector<1x4xf32>
    %21 = vector.shape_cast %20 : vector<1x4xf32> to vector<1x1x4xf32>
    %22 = vector.broadcast %21 : vector<1x1x4xf32> to vector<4x16x4xf32>
    %23 = arith.mulf %18, %22 : vector<4x16x4xf32>
    %24 = arith.addf %17, %23 : vector<4x16x4xf32>
    %c0_9 = arith.constant 0 : index
    %25 = arith.index_cast %1 : i32 to index
    %c1 = arith.constant 1 : index
    %c0_10 = arith.constant 0 : index
    %26 = vector.load %arg2[%c0_9, %25, %c1, %c0_10] : memref<1x18x18x4xf32, #tpu.memory_space<vmem>>, vector<1x6x16x4xf32>
    %27 = vector.shape_cast %26 : vector<1x6x16x4xf32> to vector<6x16x4xf32>
    %28 = vector.extract_strided_slice %27 {offsets = [0, 0, 0], sizes = [4, 16, 4], strides = [1, 1, 1]} : vector<6x16x4xf32> to vector<4x16x4xf32>
    %c1_11 = arith.constant 1 : index
    %c0_12 = arith.constant 0 : index
    %c0_13 = arith.constant 0 : index
    %29 = vector.load %arg3[%c1_11, %c0_12, %c0_13] : memref<9x1x4xf32, #tpu.memory_space<vmem>>, vector<1x1x4xf32>
    %30 = vector.shape_cast %29 : vector<1x1x4xf32> to vector<1x4xf32>
    %31 = vector.shape_cast %30 : vector<1x4xf32> to vector<1x1x4xf32>
    %32 = vector.broadcast %31 : vector<1x1x4xf32> to vector<4x16x4xf32>
    %33 = arith.mulf %28, %32 : vector<4x16x4xf32>
    %34 = arith.addf %24, %33 : vector<4x16x4xf32>
    %35 = vector.extract_strided_slice %27 {offsets = [1, 0, 0], sizes = [4, 16, 4], strides = [1, 1, 1]} : vector<6x16x4xf32> to vector<4x16x4xf32>
    %c4 = arith.constant 4 : index
    %c0_14 = arith.constant 0 : index
    %c0_15 = arith.constant 0 : index
    %36 = vector.load %arg3[%c4, %c0_14, %c0_15] : memref<9x1x4xf32, #tpu.memory_space<vmem>>, vector<1x1x4xf32>
    %37 = vector.shape_cast %36 : vector<1x1x4xf32> to vector<1x4xf32>
    %38 = vector.shape_cast %37 : vector<1x4xf32> to vector<1x1x4xf32>
    %39 = vector.broadcast %38 : vector<1x1x4xf32> to vector<4x16x4xf32>
    %40 = arith.mulf %35, %39 : vector<4x16x4xf32>
    %41 = arith.addf %34, %40 : vector<4x16x4xf32>
    %42 = vector.extract_strided_slice %27 {offsets = [2, 0, 0], sizes = [4, 16, 4], strides = [1, 1, 1]} : vector<6x16x4xf32> to vector<4x16x4xf32>
    %c7 = arith.constant 7 : index
    %c0_16 = arith.constant 0 : index
    %c0_17 = arith.constant 0 : index
    %43 = vector.load %arg3[%c7, %c0_16, %c0_17] : memref<9x1x4xf32, #tpu.memory_space<vmem>>, vector<1x1x4xf32>
    %44 = vector.shape_cast %43 : vector<1x1x4xf32> to vector<1x4xf32>
    %45 = vector.shape_cast %44 : vector<1x4xf32> to vector<1x1x4xf32>
    %46 = vector.broadcast %45 : vector<1x1x4xf32> to vector<4x16x4xf32>
    %47 = arith.mulf %42, %46 : vector<4x16x4xf32>
    %48 = arith.addf %41, %47 : vector<4x16x4xf32>
    %c0_18 = arith.constant 0 : index
    %49 = arith.index_cast %1 : i32 to index
    %c2 = arith.constant 2 : index
    %c0_19 = arith.constant 0 : index
    %50 = vector.load %arg2[%c0_18, %49, %c2, %c0_19] : memref<1x18x18x4xf32, #tpu.memory_space<vmem>>, vector<1x6x16x4xf32>
    %51 = vector.shape_cast %50 : vector<1x6x16x4xf32> to vector<6x16x4xf32>
    %52 = vector.extract_strided_slice %51 {offsets = [0, 0, 0], sizes = [4, 16, 4], strides = [1, 1, 1]} : vector<6x16x4xf32> to vector<4x16x4xf32>
    %c2_20 = arith.constant 2 : index
    %c0_21 = arith.constant 0 : index
    %c0_22 = arith.constant 0 : index
    %53 = vector.load %arg3[%c2_20, %c0_21, %c0_22] : memref<9x1x4xf32, #tpu.memory_space<vmem>>, vector<1x1x4xf32>
    %54 = vector.shape_cast %53 : vector<1x1x4xf32> to vector<1x4xf32>
    %55 = vector.shape_cast %54 : vector<1x4xf32> to vector<1x1x4xf32>
    %56 = vector.broadcast %55 : vector<1x1x4xf32> to vector<4x16x4xf32>
    %57 = arith.mulf %52, %56 : vector<4x16x4xf32>
    %58 = arith.addf %48, %57 : vector<4x16x4xf32>
    %59 = vector.extract_strided_slice %51 {offsets = [1, 0, 0], sizes = [4, 16, 4], strides = [1, 1, 1]} : vector<6x16x4xf32> to vector<4x16x4xf32>
    %c5 = arith.constant 5 : index
    %c0_23 = arith.constant 0 : index
    %c0_24 = arith.constant 0 : index
    %60 = vector.load %arg3[%c5, %c0_23, %c0_24] : memref<9x1x4xf32, #tpu.memory_space<vmem>>, vector<1x1x4xf32>
    %61 = vector.shape_cast %60 : vector<1x1x4xf32> to vector<1x4xf32>
    %62 = vector.shape_cast %61 : vector<1x4xf32> to vector<1x1x4xf32>
    %63 = vector.broadcast %62 : vector<1x1x4xf32> to vector<4x16x4xf32>
    %64 = arith.mulf %59, %63 : vector<4x16x4xf32>
    %65 = arith.addf %58, %64 : vector<4x16x4xf32>
    %66 = vector.extract_strided_slice %51 {offsets = [2, 0, 0], sizes = [4, 16, 4], strides = [1, 1, 1]} : vector<6x16x4xf32> to vector<4x16x4xf32>
    %c8 = arith.constant 8 : index
    %c0_25 = arith.constant 0 : index
    %c0_26 = arith.constant 0 : index
    %67 = vector.load %arg3[%c8, %c0_25, %c0_26] : memref<9x1x4xf32, #tpu.memory_space<vmem>>, vector<1x1x4xf32>
    %68 = vector.shape_cast %67 : vector<1x1x4xf32> to vector<1x4xf32>
    %69 = vector.shape_cast %68 : vector<1x4xf32> to vector<1x1x4xf32>
    %70 = vector.broadcast %69 : vector<1x1x4xf32> to vector<4x16x4xf32>
    %71 = arith.mulf %66, %70 : vector<4x16x4xf32>
    %72 = arith.addf %65, %71 : vector<4x16x4xf32>
    %73 = vector.shape_cast %72 : vector<4x16x4xf32> to vector<64x4xf32>
    %c0_27 = arith.constant 0 : index
    %c0_28 = arith.constant 0 : index
    %74 = vector.load %arg4[%c0_27, %c0_28] : memref<4x8xf32, #tpu.memory_space<vmem>>, vector<4x8xf32>
    %cst = arith.constant dense<0.000000e+00> : vector<64x8xf32>
    %75 = tpu.matmul %73, %74, %cst {dimension_numbers = #tpu.dot_dimension_numbers<[1], [0], [0], [1], [0, 0, 1, 1], [], []>} : vector<64x4xf32>, vector<4x8xf32>, vector<64x8xf32> -> vector<64x8xf32>
    %c0_29 = arith.constant 0 : index
    %c0_30 = arith.constant 0 : index
    %76 = vector.load %arg5[%c0_29, %c0_30] : memref<1x8xf32, #tpu.memory_space<vmem>>, vector<1x8xf32>
    %77 = vector.broadcast %76 : vector<1x8xf32> to vector<64x8xf32>
    %78 = arith.addf %75, %77 : vector<64x8xf32>
    %79 = vector.shape_cast %78 : vector<64x8xf32> to vector<4x16x8xf32>
    %c0_31 = arith.constant 0 : index
    %c0_32 = arith.constant 0 : index
    %c0_33 = arith.constant 0 : index
    %c0_34 = arith.constant 0 : index
    %80 = vector.load %arg6[%c0_31, %c0_32, %c0_33, %c0_34] : memref<1x4x16x8xf32, #tpu.memory_space<vmem>>, vector<1x4x16x8xf32>
    %81 = vector.shape_cast %80 : vector<1x4x16x8xf32> to vector<4x16x8xf32>
    %82 = vector.shape_cast %79 : vector<4x16x8xf32> to vector<1x4x16x8xf32>
    tpu.vector_store %arg6[%c0_31, %c0_32, %c0_33, %c0_34], %82 {strides = array<i32>} : memref<1x4x16x8xf32, #tpu.memory_space<vmem>>, vector<1x4x16x8xf32>,
    return
  }
  func.func @transform_0(%arg0: i32, %arg1: i32) -> (i32, i32, i32, i32) {
    %c0_i32 = arith.constant 0 : i32
    %c0_i32_0 = arith.constant 0 : i32
    %c0_i32_1 = arith.constant 0 : i32
    %c0_i32_2 = arith.constant 0 : i32
    return %arg0, %c0_i32, %c0_i32_0, %c0_i32_1 : i32, i32, i32, i32
  }
  func.func @transform_1(%arg0: i32, %arg1: i32) -> (i32, i32, i32) {
    %c0_i32 = arith.constant 0 : i32
    %c0_i32_0 = arith.constant 0 : i32
    %c0_i32_1 = arith.constant 0 : i32
    %c0_i32_2 = arith.constant 0 : i32
    return %c0_i32, %c0_i32_0, %c0_i32_1 : i32, i32, i32
  }
  func.func @transform_2(%arg0: i32, %arg1: i32) -> (i32, i32) {
    %c0_i32 = arith.constant 0 : i32
    %c0_i32_0 = arith.constant 0 : i32
    %c0_i32_1 = arith.constant 0 : i32
    return %c0_i32, %c0_i32_0 : i32, i32
  }
  func.func @transform_3(%arg0: i32, %arg1: i32) -> (i32, i32) {
    %c0_i32 = arith.constant 0 : i32
    %c0_i32_0 = arith.constant 0 : i32
    %c0_i32_1 = arith.constant 0 : i32
    return %c0_i32, %c0_i32_0 : i32, i32
  }
  func.func @transform_4(%arg0: i32, %arg1: i32) -> (i32, i32, i32, i32) {
    %c0_i32 = arith.constant 0 : i32
    %c0_i32_0 = arith.constant 0 : i32
    %c0_i32_1 = arith.constant 0 : i32
    return %arg0, %arg1, %c0_i32, %c0_i32_0 : i32, i32, i32, i32
  }
}

</mosaic_0001>

<bundles_post_ra>
// kernel: tpu_custom_call.1
= control target key start
LH: loop header
LB: loop body
LE: loop exit
PB: predicated region body
PF: predicated region fallthrough
CT: control target
= control target key end

     0   :  { %s884_s15 = smov 0   ;;  %s886_s16 = smov 0   ;;  %s1125_s0 = inlined_call_operand.vmem [shape: f32[2,18,18,4], index: 0, kind: input, shape index: {}]   ;;  %s1126_s1 = inlined_call_operand.vmem [shape: f32[9,1,4], index: 1, kind: input, shape index: {}]   ;;  %s1127_s2 = inlined_call_operand.vmem [shape: f32[4,8], index: 2, kind: input, shape index: {}]   ;;  %s1128_s3 = inlined_call_operand.vmem [shape: f32[1,8], index: 3, kind: input, shape index: {}]   ;;  %s1129_s4 = inlined_call_operand.vmem [shape: f32[2,16,16,8], index: 4, kind: output, shape index: {}]  }
   0x1   :  { %s888_s17 = smov 0   ;;  %s890_s18 = smov 0  }
   0x2   :  { %s892_s19 = smov 0  }
   0x3 LB: > { %s23_s20 = sadd.s32 1, %s849_s17  ;;  %s26_s21 = sadd.s32 1, %s853_s18  ;;  %s857_s19 = sphi %s892_s19, %s14_s19   ;;  %s853_s18 = sphi %s890_s18, %s1133_s18   ;;  %s849_s17 = sphi %s888_s17, %s1132_s17   ;;  %s845_s16 = sphi %s886_s16, %s1131_s16   ;;  %s841_s15 = sphi %s884_s15, %s1130_s15  }
   0x4   : > { %p24_p0 = scmp.ge.s32.totalorder %s23_s20, 4  ;;  %p716_p1 = scmp.ge.s32.totalorder %s857_s19, 1 }
   0x5   : > { %p176_p2 = scmp.lt.s32.totalorder %s857_s19, 9 }
   0x6   : > { %s1135_s20 = smov (%p24_p0, %s23_s20), 0  ;;  %s1137_s21 = smov (!%p24_p0, %s26_s21), %s853_s18 }
   0x7   : > { %p177_p3 = pnand %p716_p1, %p176_p2  ;;  %p28_p4 = scmp.ge.s32.totalorder %s1137_s21, 2 }
   0x8   : > { %v469_v0 = vld [vmem:[%s1127_s2] sm:$0xf] (!%p177_p3)  ;;  %vm502_vm0 = vcmask (!%p177_p3), 1043456   ;;  %p207_p5 = scmp.lt.s32.totalorder (!%p177_p3), %s845_s16, 1  ;;  %s723_s24 = smul.u32 (!%p177_p3), 96, %s841_s15  ;;  %vm477_vm1 = vcmask (!%p177_p3), 31744  }
   0x9   : > { %s1139_s21 = smov (%p28_p4, %s1137_s21), 0  ;;  %180 = sbr.rel (%p177_p3) target bundleno = 281 (0x119), region = 36 }
   0xa   : > { %762 = vmatprep.subr.msk.mxu0 (!%p177_p3), %vm502_vm0, %v469_v0  ;;  %776 = vmatprep.subr.msk.mxu1 (!%p177_p3), %vm502_vm0, %v469_v0  ;;  %v929_v1 = vld [vmem:[%s1126_s1] ss:$0 sm:$0xff] (!%p177_p3)  ;;  %v934_v2 = vld [vmem:[%s1126_s1 + $0x3] ss:$0 sm:$0xff] (!%p177_p3)  ;;  %v941_v3 = vld [vmem:[%s1126_s1 + $0x6] ss:$0 sm:$0xff] (!%p177_p3) }
   0xb   : > { %763 = vmatpush3.msk.msra.mxu0 (!%p177_p3), %vm502_vm0, %v469_v0  ;;  %777 = vmatpush3.msk.msra.mxu1 (!%p177_p3), %vm502_vm0, %v469_v0  ;;  %v946_v4 = vld [vmem:[%s1126_s1 + $0x1] ss:$0 sm:$0xff] (!%p177_p3)  ;;  %v963_v17 = vld [vmem:[%s1126_s1 + $0x4] ss:$0 sm:$0xff] (!%p177_p3)  ;;  %v970_v22 = vld [vmem:[%s1126_s1 + $0x7] ss:$0 sm:$0xff] (!%p177_p3) }
   0xc   : > { %v982_v32 = vld [vmem:[%s1126_s1 + $0x2] ss:$0 sm:$0xff] (!%p177_p3)  ;;  %v992_v40 = vld [vmem:[%s1126_s1 + $0x5] ss:$0 sm:$0xff] (!%p177_p3)  ;;  %v1002_v48 = vld [vmem:[%s1126_s1 + $0x8] ss:$0 sm:$0xff] (!%p177_p3) }
   0xd   : > { %s718_s29 = sshll.u32 (!%p177_p3), %s841_s15, 2  ;;  %vm611_vm2 = vcmask (!%p177_p3), 64512  }
   0xe   : > { %p215_p6 = scmp.lt.s32.totalorder (!%p177_p3), %s718_s29, 15 }
  0x10   : > { %s1141_s16 = smov (!%p207_p5, %s845_s16), 1  ;;  %s1143_s29 = smov (!%p215_p6, %s718_s29), 15 }
  0x11   : > { %s778_s25 = smul.u32 432, %s1141_s16  ;;  %s719_s30 = sshll.u32 %s1143_s29, 1 }
  0x12   : > { %s720_s5 = sshll.u32 %s1141_s16, 5 }
  0x13   : > { %s211_s28 = scalar_lea.vmem %s1125_s0, %s778_s25  ;;  %s219_s6 = sadd.s32 %s720_s5, %s719_s30 }
  0x14   : > { %s936_s7 = scalar_lea.vmem %s211_s28, %s723_s24 }
  0x15   : > { %v226_v5 = vld [vmem:[%s936_s7] sm:$0xff]  ;;  %v228_v6 = vld [vmem:[%s936_s7 + $0x18] sm:$0xff]  ;;  %v230_v7 = vld [vmem:[%s936_s7 + $0x30] sm:$0xff] }
  0x16   : > { %v232_v8 = vld [vmem:[%s936_s7 + $0x48] sm:$0xff]  ;;  %v245_v9 = vmul.f32 %v929_v1, %v226_v5  ;;  %v247_v10 = vmul.f32 %v929_v1, %v228_v6  ;;  %v261_v11 = vmul.f32 %v934_v2, %v228_v6  ;;  %v263_v12 = vmul.f32 %v934_v2, %v230_v7  ;;  %v303_v16 = vld [vmem:[%s936_s7 + $0x19] sm:$0xff]  ;;  %v305_v23 = vld [vmem:[%s936_s7 + $0x31] sm:$0xff] }
  0x17   : > { %v301_v13 = vld [vmem:[%s936_s7 + $0x1] sm:$0xff]  ;;  %v285_v14 = vmul.f32 %v941_v3, %v230_v7  ;;  %v287_v15 = vmul.f32 %v941_v3, %v232_v8  ;;  %v323_v21 = vmul.f32 %v946_v4, %v303_v16  ;;  %v345_v27 = vmul.f32 %v963_v17, %v303_v16  ;;  %v236_v29 = vld [vmem:[%s936_s7 + $0x78] sm:$0xff]  ;;  %v307_v36 = vld [vmem:[%s936_s7 + $0x49] sm:$0xff] }
  0x18   : > { %v269_v18 = vadd.f32 %v261_v11, %v245_v9  ;;  %v271_v19 = vadd.f32 %v263_v12, %v247_v10  ;;  %v321_v20 = vmul.f32 %v946_v4, %v301_v13  ;;  %v234_v24 = vld [vmem:[%s936_s7 + $0x60] sm:$0xff]  ;;  %v347_v28 = vmul.f32 %v963_v17, %v305_v23  ;;  %v389_v53 = vld [vmem:[%s936_s7 + $0x32] sm:$0xff]  ;;  %v227_v62 = vld [vmem:[%s936_s7 + $0x8] sm:$0xff] }
  0x19   : > { %v369_v30 = vmul.f32 %v970_v22, %v305_v23  ;;  %v385_v31 = vld [vmem:[%s936_s7 + $0x2] sm:$0xff]  ;;  %v249_v33 = vmul.f32 %v929_v1, %v230_v7  ;;  %v251_v34 = vmul.f32 %v929_v1, %v232_v8  ;;  %v265_v35 = vmul.f32 %v934_v2, %v232_v8  ;;  %v387_v39 = vld [vmem:[%s936_s7 + $0x1a] sm:$0xff]  ;;  %v1019_v11 = vld [vmem:[%s936_s7 + $0x4a] sm:$0xff] }
  0x1a   : > { %v293_v25 = vadd.f32 %v285_v14, %v269_v18  ;;  %v295_v26 = vadd.f32 %v287_v15, %v271_v19  ;;  %v267_v41 = vmul.f32 %v934_v2, %v234_v24  ;;  %v289_v42 = vmul.f32 %v941_v3, %v234_v24  ;;  %v309_v50 = vld [vmem:[%s936_s7 + $0x61] sm:$0xff]  ;;  %v311_v56 = vld [vmem:[%s936_s7 + $0x79] sm:$0xff]  ;;  %v302_v14 = vld [vmem:[%s936_s7 + $0x9] sm:$0xff] }
  0x1b   : > { %v273_v43 = vadd.f32 %v265_v35, %v249_v33  ;;  %v291_v44 = vmul.f32 %v941_v3, %v236_v29  ;;  %v325_v45 = vmul.f32 %v946_v4, %v305_v23  ;;  %v405_v47 = vmul.f32 %v982_v32, %v385_v31  ;;  %v229_v63 = vld [vmem:[%s936_s7 + $0x20] sm:$0xff]  ;;  %v231_v13 = vld [vmem:[%s936_s7 + $0x38] sm:$0xff]  ;;  %v235_v33 = vld [vmem:[%s936_s7 + $0x68] sm:$0xff] }
  0x1c   : > { %v329_v37 = vadd.f32 %v321_v20, %v293_v25  ;;  %v331_v38 = vadd.f32 %v323_v21, %v295_v26  ;;  %v275_v49 = vadd.f32 %v267_v41, %v251_v34  ;;  %v327_v51 = vmul.f32 %v946_v4, %v307_v36  ;;  %v393_v16 = vld [vmem:[%s936_s7 + $0x62] sm:$0xff] }
  0x1d   : > { %v371_v52 = vmul.f32 %v970_v22, %v307_v36  ;;  %v429_v54 = vmul.f32 %v992_v40, %v387_v39  ;;  %v297_v55 = vadd.f32 %v289_v42, %v273_v43  ;;  %v349_v57 = vmul.f32 %v963_v17, %v307_v36  ;;  %v304_v21 = vld [vmem:[%s936_s7 + $0x21] sm:$0xff]  ;;  %v386_v42 = vld [vmem:[%s936_s7 + $0xa] sm:$0xff] }
  0x1e   : > { %v353_v46 = vadd.f32 %v345_v27, %v329_v37  ;;  %v355_v58 = vadd.f32 %v347_v28, %v331_v38  ;;  %v299_v60 = vadd.f32 %v291_v44, %v275_v49  ;;  %v351_v61 = vmul.f32 %v963_v17, %v309_v50  ;;  %v233_v27 = vld [vmem:[%s936_s7 + $0x50] sm:$0xff]  ;;  %v306_v37 = vld [vmem:[%s936_s7 + $0x39] sm:$0xff]  ;;  %v388_v43 = vld [vmem:[%s936_s7 + $0x22] sm:$0xff] }
  0x1f   : > { %v407_v0 = vmul.f32 %v982_v32, %v387_v39  ;;  %v453_v5 = vmul.f32 %v1002_v48, %v389_v53  ;;  %v333_v6 = vadd.f32 %v325_v45, %v297_v55  ;;  %v373_v7 = vmul.f32 %v970_v22, %v309_v50 }
  0x20   : > { %v377_v59 = vadd.f32 %v369_v30, %v353_v46  ;;  %v335_v9 = vadd.f32 %v327_v51, %v299_v60  ;;  %v375_v10 = vmul.f32 %v970_v22, %v311_v56  ;;  %v409_v12 = vmul.f32 %v982_v32, %v389_v53  ;;  %v308_v51 = vld [vmem:[%s936_s7 + $0x51] sm:$0xff]  ;;  %v310_v56 = vld [vmem:[%s936_s7 + $0x69] sm:$0xff] }
  0x21   : > { %v357_v15 = vadd.f32 %v349_v57, %v333_v6  ;;  %v246_v18 = vmul.f32 %v929_v1, %v227_v62  ;;  %v262_v19 = vmul.f32 %v934_v2, %v229_v63  ;;  %v286_v20 = vmul.f32 %v941_v3, %v231_v13  ;;  %v390_v6 = vld [vmem:[%s936_s7 + $0x3a] sm:$0xff] }
  0x22   : > { %v413_v8 = vadd.f32 %v405_v47, %v377_v59  ;;  %v379_v23 = vadd.f32 %v371_v52, %v355_v58  ;;  %v359_v25 = vadd.f32 %v351_v61, %v335_v9  ;;  %v411_v26 = vmul.f32 %v982_v32, %v1019_v11 }
  0x23   : > { %v381_v28 = vadd.f32 %v373_v7, %v357_v15  ;;  %v433_v29 = vmul.f32 %v992_v40, %v1019_v11  ;;  %v270_v30 = vadd.f32 %v262_v19, %v246_v18  ;;  %v322_v31 = vmul.f32 %v946_v4, %v302_v14  ;;  %v394_v18 = vld [vmem:[%s936_s7 + $0x6a] sm:$0xff] }
  0x24   : > { %v437_v24 = vadd.f32 %v429_v54, %v413_v8  ;;  %v383_v35 = vadd.f32 %v375_v10, %v359_v25  ;;  %v457_v36 = vmul.f32 %v1002_v48, %v393_v16  ;;  %v346_v38 = vmul.f32 %v963_v17, %v304_v21 }
  0x25   : > { %v417_v39 = vadd.f32 %v409_v12, %v381_v28  ;;  %v294_v41 = vadd.f32 %v286_v20, %v270_v30  ;;  %v250_v44 = vmul.f32 %v929_v1, %v231_v13  ;;  %v266_v45 = vmul.f32 %v934_v2, %v233_v27  ;;  %v392_v12 = vld [vmem:[%s936_s7 + $0x52] sm:$0xff]  ;;  %v395_v30 = vld [vmem:[%s936_s7 + $0x7a] sm:$0xff] }
  0x26   : > { %v461_v34 = vadd.f32 %v453_v5, %v437_v24  ;;  %v419_v46 = vadd.f32 %v411_v26, %v383_v35  ;;  %v435_v47 = vmul.f32 %v992_v40, %v393_v16  ;;  %v370_v49 = vmul.f32 %v970_v22, %v306_v37  ;;  %v237_v26 = vld [vmem:[%s936_s7 + $0x80] sm:$0xff] }
  0x27   : > { %v290_v50 = vmul.f32 %v941_v3, %v235_v33  ;;  %v441_v52 = vadd.f32 %v433_v29, %v417_v39  ;;  %v330_v54 = vadd.f32 %v322_v31, %v294_v41  ;;  %v274_v55 = vadd.f32 %v266_v45, %v250_v44 }
  0x28   : > { %764 = vmatprep.mubr.msk.f32.mxu0 %vm477_vm1, %v461_v34  ;;  %v326_v57 = vmul.f32 %v946_v4, %v306_v37  ;;  %v415_v58 = vadd.f32 %v407_v0, %v379_v23  ;;  %v431_v59 = vmul.f32 %v992_v40, %v389_v53  ;;  %v406_v60 = vmul.f32 %v982_v32, %v386_v42 }
  0x29   : > { %v430_v61 = vmul.f32 %v992_v40, %v388_v43  ;;  %v465_v62 = vadd.f32 %v457_v36, %v441_v52  ;;  %v354_v5 = vadd.f32 %v346_v38, %v330_v54  ;;  %v298_v7 = vadd.f32 %v290_v50, %v274_v55 }
  0x2a   : > { %v350_v8 = vmul.f32 %v963_v17, %v308_v51  ;;  %v454_v9 = vmul.f32 %v1002_v48, %v390_v6  ;;  %v374_v10 = vmul.f32 %v970_v22, %v310_v56  ;;  %v248_v0 = vmul.f32 %v929_v1, %v229_v63 }
  0x2b   : > { %v264_v53 = vmul.f32 %v934_v2, %v231_v13  ;;  %v443_v14 = vadd.f32 %v435_v47, %v419_v46  ;;  %770 = vmatprep.mubr.msk.f32.mxu1 %vm477_vm1, %v465_v62  ;;  %v378_v15 = vadd.f32 %v370_v49, %v354_v5  ;;  %v334_v16 = vadd.f32 %v326_v57, %v298_v7 }
  0x2c   : > { %v288_v19 = vmul.f32 %v941_v3, %v233_v27  ;;  %v439_v20 = vadd.f32 %v431_v59, %v415_v58  ;;  %v455_v23 = vmul.f32 %v1002_v48, %v1019_v11  ;;  %v324_v25 = vmul.f32 %v946_v4, %v304_v21 }
  0x2d   : > { %v272_v24 = vadd.f32 %v264_v53, %v248_v0  ;;  %v414_v63 = vadd.f32 %v406_v60, %v378_v15  ;;  %v358_v28 = vadd.f32 %v350_v8, %v334_v16  ;;  %v410_v13 = vmul.f32 %v982_v32, %v390_v6 }
  0x2e   : > { %v434_v29 = vmul.f32 %v992_v40, %v392_v12  ;;  %v458_v31 = vmul.f32 %v1002_v48, %v394_v18  ;;  %v348_v35 = vmul.f32 %v963_v17, %v306_v37  ;;  %v252_v36 = vmul.f32 %v929_v1, %v233_v27  ;;  %v312_v27 = vld [vmem:[%s936_s7 + $0x81] sm:$0xff] }
  0x2f   : > { %v296_v34 = vadd.f32 %v288_v19, %v272_v24  ;;  %v438_v11 = vadd.f32 %v430_v61, %v414_v63  ;;  %v382_v38 = vadd.f32 %v374_v10, %v358_v28  ;;  %v268_v21 = vmul.f32 %v934_v2, %v235_v33 }
  0x30   : > { %v292_v39 = vmul.f32 %v941_v3, %v237_v26  ;;  %v463_v41 = vadd.f32 %v455_v23, %v439_v20  ;;  %v459_v42 = vmul.f32 %v1002_v48, %v395_v30  ;;  %v372_v45 = vmul.f32 %v970_v22, %v308_v51 }
  0x31   : > { %v332_v44 = vadd.f32 %v324_v25, %v296_v34  ;;  %v462_v46 = vadd.f32 %v454_v9, %v438_v11  ;;  %v418_v47 = vadd.f32 %v410_v13, %v382_v38  ;;  %v276_v49 = vadd.f32 %v268_v21, %v252_v36 }
  0x32   : > { %v328_v37 = vmul.f32 %v946_v4, %v308_v51  ;;  %v408_v1 = vmul.f32 %v982_v32, %v388_v43  ;;  %v352_v3 = vmul.f32 %v963_v17, %v310_v56  ;;  %v467_v52 = vadd.f32 %v459_v42, %v443_v14  ;;  %v396_v56 = vld [vmem:[%s936_s7 + $0x82] sm:$0xff]  ;;  %s721_s7 = sshll.u32 %s219_s6, 3 }
  0x33   : > { %v356_v50 = vadd.f32 %v348_v35, %v332_v44  ;;  %765 = vmatmul.mubr.msk.f32.vlgmr.msra.gmra.mrb[0].mxu0 %vm477_vm1, %v462_v46  ;;  %v442_v2 = vadd.f32 %v434_v29, %v418_v47  ;;  %v300_v33 = vadd.f32 %v292_v39, %v276_v49  ;;  %v432_v55 = vmul.f32 %v992_v40, %v390_v6  ;;  %s221_s12 = scalar_lea.vmem %s1129_s4, %s721_s7 }
  0x34   : > { %767 = vmatprep.mubr.msk.f32.mxu0 %vm477_vm1, %v463_v41  ;;  %v376_v4 = vmul.f32 %v970_v22, %v312_v27  ;;  %v456_v43 = vmul.f32 %v1002_v48, %v392_v12  ;;  %v412_v60 = vmul.f32 %v982_v32, %v392_v12  ;;  %v436_v62 = vmul.f32 %v992_v40, %v394_v18  ;;  %v741_v32 = vld [vmem:[%s1128_s3] ss:$0 sm:$0xff] }
  0x35   : > { %v380_v54 = vadd.f32 %v372_v45, %v356_v50  ;;  %v466_v57 = vadd.f32 %v458_v31, %v442_v2  ;;  %v336_v58 = vadd.f32 %v328_v37, %v300_v33  ;;  %v460_v22 = vmul.f32 %v1002_v48, %v396_v56 }
  0x37   : > { %v416_v51 = vadd.f32 %v408_v1, %v380_v54  ;;  %771 = vmatmul.mubr.msk.f32.vlgmr.msra.gmra.mrb[0].mxu1 %vm477_vm1, %v466_v57  ;;  %v360_v59 = vadd.f32 %v352_v3, %v336_v58 }
  0x38   : > { %773 = vmatprep.mubr.msk.f32.mxu1 %vm477_vm1, %v467_v52 }
  0x39   : > { %v440_v17 = vadd.f32 %v432_v55, %v416_v51  ;;  %v384_v61 = vadd.f32 %v376_v4, %v360_v59 }
  0x3b   : > { %v464_v5 = vadd.f32 %v456_v43, %v440_v17  ;;  %v420_v6 = vadd.f32 %v412_v60, %v384_v61 }
  0x3d   : > { %768 = vmatmul.mubr.msk.f32.gmra.mrb[2].mxu0 %vm477_vm1, %v464_v5  ;;  %v444_v7 = vadd.f32 %v436_v62, %v420_v6 }
  0x3f   : > { %v468_v8 = vadd.f32 %v460_v22, %v444_v7 }
  0x41   : > { %774 = vmatmul.mubr.msk.f32.gmra.mrb[2].mxu1 %vm477_vm1, %v468_v8 }
 0x106   : > { %v766_v40 = vpop.f32.mrb[0].mxu0 }
 0x107   : > { %v578_v48 = vadd.f32 %v766_v40, %v741_v32  ;;  %v572_v9 = vpop.f32.mrb[1].mxu0 }
 0x108   : > { %v573_v10 = vadd.f32 %v741_v32, %v572_v9 }
 0x109   : > { %613 = vst.msk [vmem:[%s221_s12 + $0x8] sm:$0xff] %vm611_vm2, %v578_v48 }
 0x10a   : > { %v772_v12 = vpop.f32.mrb[0].mxu1  ;;  %612 = vst.msk [vmem:[%s221_s12] sm:$0xff] %vm611_vm2, %v573_v10 }
 0x10b   : > { %v598_v0 = vadd.f32 %v772_v12, %v741_v32  ;;  %v592_v53 = vpop.f32.mrb[1].mxu1 }
 0x10c   : > { %v593_v14 = vadd.f32 %v741_v32, %v592_v53 }
 0x10d   : > { %617 = vst.msk [vmem:[%s221_s12 + $0x28] sm:$0xff] %vm611_vm2, %v598_v0 }
 0x10e   : > { %616 = vst.msk [vmem:[%s221_s12 + $0x20] sm:$0xff] %vm611_vm2, %v593_v14 }
 0x110   : > { %v769_v15 = vpop.f32.mrb[2].mxu0 }
 0x111   : > { %v588_v16 = vadd.f32 %v769_v15, %v741_v32  ;;  %v582_v18 = vpop.f32.mrb[3].mxu0 }
 0x112   : > { %v583_v19 = vadd.f32 %v741_v32, %v582_v18 }
 0x113   : > { %615 = vst.msk [vmem:[%s221_s12 + $0x18] sm:$0xff] %vm611_vm2, %v588_v16 }
 0x114   : > { %614 = vst.msk [vmem:[%s221_s12 + $0x10] sm:$0xff] %vm611_vm2, %v583_v19  ;;  %v775_v20 = vpop.f32.mrb[2].mxu1 }
 0x115   : > { %v608_v23 = vadd.f32 %v775_v20, %v741_v32  ;;  %v602_v24 = vpop.f32.mrb[3].mxu1 }
 0x116   : > { %v603_v25 = vadd.f32 %v741_v32, %v602_v24 }
 0x117   : > { %619 = vst.msk [vmem:[%s221_s12 + $0x38] sm:$0xff] %vm611_vm2, %v608_v23 }
 0x118   : > { %618 = vst.msk [vmem:[%s221_s12 + $0x30] sm:$0xff] %vm611_vm2, %v603_v25 }
 0x119 PF: > { %s14_s19 = sadd.s32 1, %s857_s19   ;;  %s1130_s15 = smov %s849_s17 }
 0x11a   : > { %p11_p7 = scmp.ge.s32.totalorder %s14_s19, 10   ;;  %s1131_s16 = smov %s853_s18 }
 0x11b   : > { %s1132_s17 = smov %s1135_s20  ;;  %s1133_s18 = smov %s1139_s21 }
 0x11c   :  { %13 = sbr.rel (!%p11_p7) target bundleno = 3 (0x3), region = 75 }

</bundles_post_ra>
